<compile_context>
chip_gen: v6e
topology: v6e:2x2x1
jax: 0.10.0
libtpu: 0.0.40
codegen_flags: <defaults>
</compile_context>

<pallas_src>
import jax
import jax.numpy as jnp
from jax.experimental import pallas as pl
from jax.experimental.pallas import tpu as pltpu


def _round_up(x, m):
    return ((x + m - 1) // m) * m


_VMEM_BUDGET = 24 * 1024 * 1024  # target double-buffered working set (bytes)


# ----------------------------- kernels ------------------------------------


def _logreg_kernel_fullk(x_ref, w_ref, b_ref, o_ref):
    # x_ref: [tm, F]  w_ref: [F, tn]  b_ref: [1, tn]  o_ref: [tm, tn]
    acc = jnp.dot(x_ref[...], w_ref[...], preferred_element_type=jnp.float32)
    o_ref[...] = (acc + b_ref[...].astype(jnp.float32)).astype(o_ref.dtype)


def _logreg_kernel_ktiled(x_ref, w_ref, b_ref, o_ref, acc_ref):
    # x_ref: [tm, tk]  w_ref: [tk, tn]  b_ref: [1, tn]  o_ref/acc_ref: [tm, tn]
    k = pl.program_id(2)

    @pl.when(k == 0)
    def _():
        acc_ref[...] = jnp.broadcast_to(
            b_ref[...].astype(jnp.float32), acc_ref.shape)

    acc_ref[...] += jnp.dot(x_ref[...], w_ref[...],
                            preferred_element_type=jnp.float32)

    @pl.when(k == pl.num_programs(2) - 1)
    def _():
        o_ref[...] = acc_ref[...].astype(o_ref.dtype)


# ----------------------------- wrapper -------------------------------------


def _pick_tn(Cp):
    # Prefer one N block so the activation is streamed exactly once.
    if Cp <= 1024:
        return Cp
    for tn in (512, 256, 128):
        if Cp % tn == 0:
            return tn
    return 128


def _maybe_split_for_two_cores(B, tm, grid_n):
    # v7x has two TensorCores; expose >= 2 parallel blocks when possible.
    grid_m = (B + tm - 1) // tm
    if grid_m * grid_n < 2 and B >= 16:
        tm = _round_up((B + 1) // 2, 8)
        grid_m = (B + tm - 1) // tm
    return tm, grid_m


def logreg_forward(seq, weight, bias):
    """seq: [B, F], weight: [C, F] (PyTorch layout), bias: [C] -> [B, C]."""
    B, F = seq.shape
    C = weight.shape[0]
    itemsize = jnp.dtype(seq.dtype).itemsize

    Cp = _round_up(C, 128)
    tn = _pick_tn(Cp)
    grid_n = Cp // tn

    # One-time HBM copy of the (small) weight: transpose to [F, Cp] so the
    # kernel RHS is a standard [K, N] MXU operand. Bias -> lane-dense [1, Cp].
    w_t = jnp.pad(weight.T, ((0, 0), (0, Cp - C)))
    b_p = jnp.pad(bias, (0, Cp - C)).reshape(1, Cp)

    # --- primary path: full-F K block (no activation padding, no K axis) ---
    def ws_single(tm_):
        return itemsize * 2 * (tm_ * F + F * tn + tm_ * tn + 8 * tn)

    tm = min(512, _round_up(B, 8))
    while tm > 64 and ws_single(tm) > _VMEM_BUDGET:
        tm = max(64, _round_up(tm // 2, 8))
    use_single = ws_single(tm) <= _VMEM_BUDGET

    if use_single:
        tm, grid_m = _maybe_split_for_two_cores(B, tm, grid_n)
        ws = ws_single(tm)
        vmem_limit = min(48 << 20, max(ws + (4 << 20), 16 << 20))
        cost = pl.CostEstimate(
            flops=2 * B * F * Cp,
            transcendentals=0,
            bytes_accessed=itemsize * (B * F + F * Cp + B * Cp) + 4 * Cp,
        )
        out = pl.pallas_call(
            _logreg_kernel_fullk,
            out_shape=jax.ShapeDtypeStruct((B, Cp), seq.dtype),
            grid_spec=pltpu.PrefetchScalarGridSpec(
                num_scalar_prefetch=0,
                grid=(grid_m, grid_n),
                in_specs=[
                    pl.BlockSpec((tm, F), lambda i, j: (i, 0)),   # x tile
                    pl.BlockSpec((F, tn), lambda i, j: (0, j)),   # W^T tile
                    pl.BlockSpec((1, tn), lambda i, j: (0, j)),   # bias tile
                ],
                out_specs=pl.BlockSpec((tm, tn), lambda i, j: (i, j)),
            ),
            compiler_params=pltpu.CompilerParams(
                dimension_semantics=("parallel", "parallel"),
                vmem_limit_bytes=vmem_limit,
            ),
            cost_estimate=cost,
        )(seq, w_t, b_p)
        return out[:, :C]

    # --- fallback: K-tiled reduction for very large feature dims ---
    def ws_ktiled(tm_, tk_):
        return (itemsize * 2 * (tm_ * tk_ + tk_ * tn + tm_ * tn + 8 * tn)
                + 4 * tm_ * tn)

    tm = min(512, _round_up(B, 8))
    while tm > 8 and ws_ktiled(tm, 128) > _VMEM_BUDGET:
        tm = max(8, _round_up(tm // 2, 8))
    tk = 128
    for cand in (2048, 1024, 512, 256):
        if ws_ktiled(tm, cand) <= _VMEM_BUDGET:
            tk = cand
            break
    tm, grid_m = _maybe_split_for_two_cores(B, tm, grid_n)

    Fp = _round_up(F, tk)
    # Zero-padding the contraction axis is exact; batch axis stays unpadded.
    xp = jnp.pad(seq, ((0, 0), (0, Fp - F)))
    wp = jnp.pad(weight.T, ((0, Fp - F), (0, Cp - C)))

    ws = ws_ktiled(tm, tk)
    vmem_limit = min(48 << 20, max(ws + (4 << 20), 16 << 20))
    cost = pl.CostEstimate(
        flops=2 * B * Fp * Cp,
        transcendentals=0,
        bytes_accessed=itemsize * (grid_n * B * Fp + Fp * Cp + B * Cp) + 4 * Cp,
    )
    out = pl.pallas_call(
        _logreg_kernel_ktiled,
        out_shape=jax.ShapeDtypeStruct((B, Cp), seq.dtype),
        grid_spec=pltpu.PrefetchScalarGridSpec(
            num_scalar_prefetch=0,
            grid=(grid_m, grid_n, Fp // tk),
            in_specs=[
                pl.BlockSpec((tm, tk), lambda i, j, k: (i, k)),   # x tile
                pl.BlockSpec((tk, tn), lambda i, j, k: (k, j)),   # W^T tile
                pl.BlockSpec((1, tn), lambda i, j, k: (0, j)),    # bias tile
            ],
            out_specs=pl.BlockSpec((tm, tn), lambda i, j, k: (i, j)),
            scratch_shapes=[pltpu.VMEM((tm, tn), jnp.float32)],
        ),
        compiler_params=pltpu.CompilerParams(
            dimension_semantics=("parallel", "parallel", "arbitrary"),
            vmem_limit_bytes=vmem_limit,
        ),
        cost_estimate=cost,
    )(xp, wp, b_p)
    return out[:, :C]


def xavier_uniform(key, shape, dtype=jnp.float32):
    # Matches torch.nn.init.xavier_uniform_ for a Linear weight [out, in].
    fan_out, fan_in = shape
    limit = (6.0 / (fan_in + fan_out)) ** 0.5
    return jax.random.uniform(key, shape, dtype, minval=-limit, maxval=limit)


if __name__ == "__main__":
    key = jax.random.PRNGKey(0)
    k_x, k_w = jax.random.split(key)

    batch, ft_in, nb_classes = 8, 32, 16
    seq = jax.random.normal(k_x, (batch, ft_in), dtype=jnp.float32)

    # weights_init semantics: xavier-uniform weight, zero bias.
    weight = xavier_uniform(k_w, (nb_classes, ft_in))
    bias = jnp.zeros((nb_classes,), dtype=jnp.float32)

    out = logreg_forward(seq, weight, bias)
    jax.block_until_ready(out)

    # Cross-check against plain JAX reference (PyTorch Linear semantics).
    ref = seq @ weight.T + bias
    assert out.shape == (batch, nb_classes)
    assert jnp.allclose(out, ref, atol=1e-5, rtol=1e-5)
    print("KERNEL_OK")
</pallas_src>

<mosaic_0001>
module attributes {stable_mosaic.version = 11 : i64} {
  func.func @_logreg_kernel_fullk(%arg0: i32, %arg1: i32, %arg2: memref<8x32xf32, #tpu.memory_space<vmem>>, %arg3: memref<32x128xf32, #tpu.memory_space<vmem>>, %arg4: memref<1x128xf32, #tpu.memory_space<vmem>>, %arg5: memref<8x128xf32, #tpu.memory_space<vmem>>) attributes {dimension_semantics = [#tpu.dimension_semantics<parallel>, #tpu.dimension_semantics<parallel>], iteration_bounds = array<i64: 1, 1>, scalar_prefetch = 0 : i64, scratch_operands = 0 : i64, tpu.core_type = #tpu.core_type<tc>, window_params = [{transform_indices = @transform_0, window_bounds = array<i64: 8, 32>}, {transform_indices = @transform_1, window_bounds = array<i64: 32, 128>}, {transform_indices = @transform_2, window_bounds = array<i64: 1, 128>}, {transform_indices = @transform_3, window_bounds = array<i64: 8, 128>}]} {
    %c0 = arith.constant 0 : index
    %c0_0 = arith.constant 0 : index
    %0 = vector.load %arg2[%c0, %c0_0] : memref<8x32xf32, #tpu.memory_space<vmem>>, vector<8x32xf32>
    %c0_1 = arith.constant 0 : index
    %c0_2 = arith.constant 0 : index
    %1 = vector.load %arg3[%c0_1, %c0_2] : memref<32x128xf32, #tpu.memory_space<vmem>>, vector<32x128xf32>
    %cst = arith.constant dense<0.000000e+00> : vector<8x128xf32>
    %2 = tpu.matmul %0, %1, %cst {dimension_numbers = #tpu.dot_dimension_numbers<[1], [0], [0], [1], [0, 0, 1, 1], [], []>} : vector<8x32xf32>, vector<32x128xf32>, vector<8x128xf32> -> vector<8x128xf32>
    %c0_3 = arith.constant 0 : index
    %c0_4 = arith.constant 0 : index
    %3 = vector.load %arg4[%c0_3, %c0_4] : memref<1x128xf32, #tpu.memory_space<vmem>>, vector<1x128xf32>
    %4 = vector.broadcast %3 : vector<1x128xf32> to vector<8x128xf32>
    %5 = arith.addf %2, %4 : vector<8x128xf32>
    %c0_5 = arith.constant 0 : index
    %c0_6 = arith.constant 0 : index
    %6 = vector.load %arg5[%c0_5, %c0_6] : memref<8x128xf32, #tpu.memory_space<vmem>>, vector<8x128xf32>
    tpu.vector_store %arg5[%c0_5, %c0_6], %5 {strides = array<i32>} : memref<8x128xf32, #tpu.memory_space<vmem>>, vector<8x128xf32>,
    return
  }
  func.func @transform_0(%arg0: i32, %arg1: i32) -> (i32, i32) {
    %c0_i32 = arith.constant 0 : i32
    %c0_i32_0 = arith.constant 0 : i32
    return %arg0, %c0_i32 : i32, i32
  }
  func.func @transform_1(%arg0: i32, %arg1: i32) -> (i32, i32) {
    %c0_i32 = arith.constant 0 : i32
    %c0_i32_0 = arith.constant 0 : i32
    return %c0_i32, %arg1 : i32, i32
  }
  func.func @transform_2(%arg0: i32, %arg1: i32) -> (i32, i32) {
    %c0_i32 = arith.constant 0 : i32
    %c0_i32_0 = arith.constant 0 : i32
    return %c0_i32, %arg1 : i32, i32
  }
  func.func @transform_3(%arg0: i32, %arg1: i32) -> (i32, i32) {
    %c0_i32 = arith.constant 0 : i32
    return %arg0, %arg1 : i32, i32
  }
}

</mosaic_0001>

<bundles_post_ra>
// kernel: tpu_custom_call.1
= control target key start
LH: loop header
LB: loop body
LE: loop exit
PB: predicated region body
PF: predicated region fallthrough
CT: control target
= control target key end

     0   :  { %8 = vsyncpa [#allocation3], 0  ;;  %s274_s0 = inlined_call_operand.hbm [shape: f32[8,32], index: 0, kind: input, shape index: {}]   ;;  %s275_s1 = inlined_call_operand.hbm [shape: f32[32,128], index: 1, kind: input, shape index: {}]   ;;  %s276_s2 = inlined_call_operand.vmem [shape: f32[1,128], index: 2, kind: input, shape index: {}]   ;;  %s277_s3 = inlined_call_operand.hbm [shape: f32[8,128], index: 3, kind: output, shape index: {}]  }
   0x1   :  { %9 = vsyncpa [#allocation6], 0 }
   0x2   :  { %10 = vsyncpa [#allocation4], 0  ;;  %s235_s12 = smov [#allocation2]   ;;  %s236_s14 = smov [#allocation5]  }
   0x3   :  { %s17_s13 = sshll.u32 %s235_s12, 4  ;;  %s26_s15 = sshll.u32 %s236_s14, 4  ;;  %s18_s13 = int_to_ptr.vmem [resolvable:$true] %s17_s13  ;;  %s27_s15 = int_to_ptr.vmem [resolvable:$true] %s26_s15 }
   0x4   :  { %s177_s16 = scalar_lea.vmem %s18_s13, 128  ;;  %p182_p1 = scmp.lt.s32.totalorder %s18_s13, %s18_s13 }
   0x5   :  { %p178_p0 = scmp.ne.s32.totalorder %s18_s13, %s177_s16  ;;  %p183_p2 = scmp.lt.s32.totalorder %s177_s16, %s177_s16 }
   0x7   :  { %p184_p3 = por %p183_p2, %p182_p1 }
   0x9   :  { %p185_p4 = pnand %p184_p3, %p178_p0 }
   0xb   :  { %188 = shalt.err (!%p185_p4)
}
   0xc   :  { %20 = dma.hbm_to_vmem [thread:$0]  %s274_s0, 128, %s18_s13, [#allocation3]  }
   0xd   :  { %s197_s19 = scalar_lea.vmem %s27_s15, 512  ;;  %p202_p6 = scmp.lt.s32.totalorder %s27_s15, %s27_s15 }
   0xe   :  { %p198_p5 = scmp.ne.s32.totalorder %s27_s15, %s197_s19  ;;  %p203_p7 = scmp.lt.s32.totalorder %s197_s19, %s197_s19 }
  0x10   :  { %p204_p8 = por %p203_p7, %p202_p6 }
  0x12   :  { %p205_p9 = pnand %p204_p8, %p198_p5 }
  0x14   :  { %208 = shalt.err (!%p205_p9)
}
  0x15   :  { %s237_s20 = smov 128   ;;  %s238_s21 = smov 8  }
  0x16   :  { %32 = dma.hbm_to_vmem [thread:$0]  %s275_s1, 512, %s27_s15, [#allocation6], %s237_s20, %s237_s20, %s238_s21  }
  0x17   :  { %229 = dma.done.wait [#allocation3], 128  }
  0x18   :  { %230 = vsyncadd [#allocation3], 4294967168 }
  0x19   :  { %231 = dma.done.wait [#allocation6], 512  }
  0x1a   :  { %232 = vsyncadd [#allocation6], 4294966784  ;;  %v239_v0 = vmov 0.0   ;;  %vm240_vm0 = vmmov 0   ;;  %v45_v1 = vld [vmem:[#allocation5 + $0x18] sm:$0xff]  ;;  %v44_v2 = vld [vmem:[#allocation5 + $0x10] sm:$0xff] }
  0x1b   :  { %151 = vmatprep.subr.mxu0 %v239_v0  ;;  %159 = vmatprep.mubr.msk.f32.mxu0 %vm240_vm0, %v239_v0  ;;  %v43_v3 = vld [vmem:[#allocation5 + $0x8] sm:$0xff]  ;;  %v42_v4 = vld [vmem:[#allocation5] sm:$0xff]  ;;  %v41_v5 = vld [vmem:[#allocation2] sm:$0xff]  ;;  %vm53_vm1 = vcmask 261120   ;;  %s241_s24 = smov [#allocation7]  }
  0x1c   :  { %152 = vmatpush3.msra.mxu0 %v45_v1  ;;  %v144_v6 = vld [vmem:[%s276_s2] ss:$0 sm:$0xff]  ;;  %s134_s25 = sshll.u32 %s241_s24, 4  ;;  %s135_s25 = int_to_ptr.vmem [resolvable:$true] %s134_s25 }
  0x1d   :  { %153 = vmatprep.subr.mxu0 %v239_v0  ;;  %s209_s26 = scalar_lea.vmem %s135_s25, 128  ;;  %p214_p11 = scmp.lt.s32.totalorder %s135_s25, %s135_s25 }
  0x1e   :  { %154 = vmatpush3.msra.mxu0 %v44_v2  ;;  %p210_p10 = scmp.ne.s32.totalorder %s135_s25, %s209_s26  ;;  %p215_p12 = scmp.lt.s32.totalorder %s209_s26, %s209_s26 }
  0x1f   :  { %155 = vmatprep.subr.mxu0 %v239_v0 }
  0x20   :  { %156 = vmatpush3.msra.mxu0 %v43_v3  ;;  %p216_p13 = por %p215_p12, %p214_p11 }
  0x21   :  { %157 = vmatprep.subr.mxu0 %v239_v0 }
  0x22   :  { %158 = vmatpush3.msra.mxu0 %v42_v4  ;;  %p217_p0 = pnand %p216_p13, %p210_p10 }
  0x23   :  { %160 = vmatmul.mubr.msk.f32.vlgmr.msra.gmra.mxu0 %vm53_vm1, %v41_v5 }
  0xe3   :  { %v123_v7 = vpop.f32.mrf.mxu0 }
  0xe4   :  { %v124_v8 = vadd.f32 %v144_v6, %v123_v7 }
  0xe5   :  { %v161_v9 = vpop.f32.mrf.mxu0 }
  0xe6   :  { %127 = vst [vmem:[#allocation7] sm:$0xff] %v124_v8 }
  0xe7   :  { %220 = shalt.err (!%p217_p0)
}
  0xe8   :  { %137 = dma.vmem_to_hbm [thread:$0]  %s135_s25, 128, %s277_s3, [#allocation4]  }
  0xe9   :  { %233 = dma.done.wait [#allocation4], 128  }
  0xea   :  { %234 = vsyncadd [#allocation4], 4294967168 }
  0xeb   :  { %141 = vsyncpa [#allocation3], 1 }
  0xec   :  { %142 = vsyncpa [#allocation6], 1 }
  0xed   :  { %143 = vsyncpa [#allocation4], 1 }

</bundles_post_ra>
